<compile_context>
chip_gen: v5e
topology: v5e:2x2
jax: 0.10.0
libtpu: 0.0.40
codegen_flags: <defaults>
</compile_context>

<pallas_src>
import numpy as np

import jax
import jax.numpy as jnp
from jax.experimental import pallas as pl
from jax.experimental.pallas import tpu as pltpu


def _round_up(x, m):
    return ((x + m - 1) // m) * m


def _pad2d(x, rows, cols):
    r, c = x.shape
    return jnp.pad(x, ((0, rows - r), (0, cols - c)))


def _fused_readout_linear_kernel(lo_ref, hi_ref,                  # scalar prefetch (SMEM)
                                 start_ref, end_ref, inv_ref,     # per-molecule scope columns
                                 ea_ref, eb_ref,                  # embedding row tiles (bf16)
                                 wa_ref, wb_ref, ba_ref, bb_ref,  # linear heads
                                 oa_ref, ob_ref,                  # outputs
                                 acc_a, acc_b):                   # f32 scratch accumulators
    """out_x[m] = mean_{r in scope(m)} E_x[r] @ W_x^T + b_x  for two heads sharing a scope."""
    i = pl.program_id(0)            # molecule tile
    k = pl.program_id(1)            # row (reduction) tile
    nk = pl.num_programs(1)
    tm = acc_a.shape[0]
    tr = ea_ref.shape[0]

    @pl.when(k == 0)
    def _():
        acc_a[...] = jnp.zeros_like(acc_a)
        acc_b[...] = jnp.zeros_like(acc_b)

    row0 = k * tr
    # Skip row tiles that cannot contain any row of this molecule tile's scopes.
    in_band = jnp.logical_and(row0 < hi_ref[i], row0 + tr > lo_ref[i])

    @pl.when(in_band)
    def _():
        r_ids = jax.lax.broadcasted_iota(jnp.int32, (tm, tr), 1) + row0
        sel = jnp.logical_and(r_ids >= start_ref[...], r_ids < end_ref[...])
        s = sel.astype(jnp.bfloat16)  # 0/1 indicator -> exact in bf16
        acc_a[...] += jnp.dot(s, ea_ref[...], preferred_element_type=jnp.float32)
        acc_b[...] += jnp.dot(s, eb_ref[...], preferred_element_type=jnp.float32)

    @pl.when(k == nk - 1)
    def _():
        pooled_a = acc_a[...] * inv_ref[...]     # segment sum -> segment mean
        pooled_b = acc_b[...] * inv_ref[...]
        oa_ref[...] = (jnp.dot(pooled_a, wa_ref[...],
                               preferred_element_type=jnp.float32)
                       + ba_ref[...]).astype(oa_ref.dtype)
        ob_ref[...] = (jnp.dot(pooled_b, wb_ref[...],
                               preferred_element_type=jnp.float32)
                       + bb_ref[...]).astype(ob_ref.dtype)


def _readout_linear_pair(band_lo, band_hi, start_col, end_col, inv_col,
                         e_a, e_b, w_a_t, w_b_t, b_a, b_b, tm, tr):
    """One pallas_call computing both heads of a branch pair (shared scope)."""
    Mp = start_col.shape[0]
    Rp, Fp = e_a.shape
    Gp = w_a_t.shape[1]
    grid = (Mp // tm, Rp // tr)

    # Exact-ish per-step VMEM budget: double-buffered blocks + scratch + 25% headroom.
    tiny_col = tm * 128 * 4                      # (tm, 1) block padded to 128 lanes
    per_step = (2 * 3 * tiny_col                 # start / end / 1-size columns
                + 2 * 2 * tr * Fp * 2            # e_a, e_b tiles (bf16)
                + 2 * 2 * Fp * Gp * 4            # W_a^T, W_b^T
                + 2 * 2 * 8 * Gp * 4             # biases (padded to 8 sublanes)
                + 2 * 2 * tm * Gp * 4            # two output tiles
                + 2 * tm * Fp * 4)               # f32 scratch accumulators
    vmem_limit = max(4 << 20, min(48 << 20, int(per_step * 1.25)))

    return pl.pallas_call(
        _fused_readout_linear_kernel,
        out_shape=(jax.ShapeDtypeStruct((Mp, Gp), jnp.float32),
                   jax.ShapeDtypeStruct((Mp, Gp), jnp.float32)),
        grid_spec=pltpu.PrefetchScalarGridSpec(
            num_scalar_prefetch=2,               # band_lo, band_hi -> SMEM
            grid=grid,
            in_specs=[
                pl.BlockSpec((tm, 1), lambda i, k, lo, hi: (i, 0)),    # scope start
                pl.BlockSpec((tm, 1), lambda i, k, lo, hi: (i, 0)),    # scope end
                pl.BlockSpec((tm, 1), lambda i, k, lo, hi: (i, 0)),    # 1 / size
                pl.BlockSpec((tr, Fp), lambda i, k, lo, hi: (k, 0)),   # embedding A rows
                pl.BlockSpec((tr, Fp), lambda i, k, lo, hi: (k, 0)),   # embedding B rows
                pl.BlockSpec((Fp, Gp), lambda i, k, lo, hi: (0, 0)),   # W_a^T
                pl.BlockSpec((Fp, Gp), lambda i, k, lo, hi: (0, 0)),   # W_b^T
                pl.BlockSpec((1, Gp), lambda i, k, lo, hi: (0, 0)),    # bias_a
                pl.BlockSpec((1, Gp), lambda i, k, lo, hi: (0, 0)),    # bias_b
            ],
            out_specs=[pl.BlockSpec((tm, Gp), lambda i, k, lo, hi: (i, 0)),
                       pl.BlockSpec((tm, Gp), lambda i, k, lo, hi: (i, 0))],
            scratch_shapes=[pltpu.VMEM((tm, Fp), jnp.float32),
                            pltpu.VMEM((tm, Fp), jnp.float32)],
        ),
        compiler_params=pltpu.CompilerParams(
            dimension_semantics=("parallel", "arbitrary"),
            vmem_limit_bytes=vmem_limit),
    )(band_lo, band_hi, start_col, end_col, inv_col,
      e_a, e_b, w_a_t, w_b_t, b_a, b_b)


def _scope_arrays(scope, m_pad, tm):
    """Per-molecule (start, end, 1/size) columns and per-molecule-tile row bands."""
    starts = np.zeros((m_pad, 1), np.int32)
    ends = np.zeros((m_pad, 1), np.int32)
    inv = np.zeros((m_pad, 1), np.float32)
    n_tiles = m_pad // tm
    lo = np.full((n_tiles,), np.iinfo(np.int32).max, np.int64)
    hi = np.zeros((n_tiles,), np.int64)
    for m, (start, size) in enumerate(scope):
        starts[m, 0] = start
        ends[m, 0] = start + size
        if size > 0:
            inv[m, 0] = 1.0 / float(size)
            t = m // tm
            lo[t] = min(lo[t], start)
            hi[t] = max(hi[t], start + size)
    lo = np.where(hi > 0, lo, 0).astype(np.int32)
    hi = hi.astype(np.int32)
    return (jnp.asarray(starts), jnp.asarray(ends), jnp.asarray(inv),
            jnp.asarray(lo), jnp.asarray(hi))


def grover_functional_group_predictor(embeddings, atom_scope, bond_scope, params):
    """Forward of GroverFunctionalGroupPredictor (mean readout + 4 linear heads)."""
    in_features, fg_size = params['w_atom_from_atom_t'].shape
    num_mols = len(atom_scope)
    assert len(bond_scope) == num_mols

    Fp = _round_up(in_features, 128)
    Gp = _round_up(fg_size, 128)
    # tm = 128: v5e-MXU-native LHS tile, megacore friendly once Mp//tm >= 2;
    # shrink for tiny batches to avoid molecule-axis padding waste.
    Mp8 = _round_up(max(num_mols, 1), 8)
    tm = min(128, Mp8)
    Mp = _round_up(max(num_mols, 1), tm)

    def run_branch(scope, emb_a, emb_b, wa, ba, wb, bb):
        num_rows = emb_a.shape[0]
        # Row (reduction) tile: MXU-friendly, capped so per-step VMEM stays small.
        tr = min(512, _round_up(num_rows, 128))
        Rp = _round_up(num_rows, tr)

        starts, ends, inv, lo, hi = _scope_arrays(scope, Mp, tm)
        e_a = _pad2d(emb_a.astype(jnp.bfloat16), Rp, Fp)
        e_b = _pad2d(emb_b.astype(jnp.bfloat16), Rp, Fp)
        wa_p = _pad2d(wa.astype(jnp.float32), Fp, Gp)
        wb_p = _pad2d(wb.astype(jnp.float32), Fp, Gp)
        ba_p = _pad2d(ba.reshape(1, -1).astype(jnp.float32), 1, Gp)
        bb_p = _pad2d(bb.reshape(1, -1).astype(jnp.float32), 1, Gp)

        oa, ob = _readout_linear_pair(lo, hi, starts, ends, inv,
                                      e_a, e_b, wa_p, wb_p, ba_p, bb_p, tm, tr)
        return oa[:num_mols, :fg_size], ob[:num_mols, :fg_size]

    preds = {'atom_from_atom': None, 'atom_from_bond': None,
             'bond_from_atom': None, 'bond_from_bond': None}

    # TODO(synk): handle the case where only one embedding of a scope pair is
    # not-None (PyTorch checks each branch independently); here both are given.
    if (embeddings.get('bond_from_atom') is not None
            and embeddings.get('bond_from_bond') is not None):
        pba, pbb = run_branch(
            bond_scope,
            embeddings['bond_from_atom'], embeddings['bond_from_bond'],
            params['w_bond_from_atom_t'], params['b_bond_from_atom'],
            params['w_bond_from_bond_t'], params['b_bond_from_bond'])
        preds['bond_from_atom'] = pba
        preds['bond_from_bond'] = pbb

    if (embeddings.get('atom_from_atom') is not None
            and embeddings.get('atom_from_bond') is not None):
        paa, pab = run_branch(
            atom_scope,
            embeddings['atom_from_atom'], embeddings['atom_from_bond'],
            params['w_atom_from_atom_t'], params['b_atom_from_atom'],
            params['w_atom_from_bond_t'], params['b_atom_from_bond'])
        preds['atom_from_atom'] = paa
        preds['atom_from_bond'] = pab

    return preds


# ---------------------------------------------------------------------------
# pure-JAX reference (mirrors the PyTorch code path) for a correctness check
# ---------------------------------------------------------------------------
def _readout_mean_ref(emb, scope):
    rows = []
    for (start, size) in scope:
        if size == 0:
            rows.append(jnp.zeros((emb.shape[1],), jnp.float32))
        else:
            rows.append(jnp.mean(emb[start:start + size].astype(jnp.float32),
                                 axis=0))
    return jnp.stack(rows)


def _predictor_ref(embeddings, atom_scope, bond_scope, params):
    out = {}
    out['bond_from_atom'] = (_readout_mean_ref(embeddings['bond_from_atom'], bond_scope)
                             @ params['w_bond_from_atom_t'] + params['b_bond_from_atom'])
    out['bond_from_bond'] = (_readout_mean_ref(embeddings['bond_from_bond'], bond_scope)
                             @ params['w_bond_from_bond_t'] + params['b_bond_from_bond'])
    out['atom_from_atom'] = (_readout_mean_ref(embeddings['atom_from_atom'], atom_scope)
                             @ params['w_atom_from_atom_t'] + params['b_atom_from_atom'])
    out['atom_from_bond'] = (_readout_mean_ref(embeddings['atom_from_bond'], atom_scope)
                             @ params['w_atom_from_bond_t'] + params['b_atom_from_bond'])
    return out


if __name__ == "__main__":
    # Shapes from the module's docstring example.
    IN_FEATURES = 8
    FG_SIZE = 20
    NUM_ATOMS = 10
    NUM_BONDS = 20
    atom_scope = [(0, 3), (3, 3), (6, 4)]
    bond_scope = [(0, 5), (5, 4), (9, 11)]
    num_mols = len(atom_scope)

    key = jax.random.PRNGKey(0)
    ks = jax.random.split(key, 12)

    embeddings = {
        'bond_from_atom': jax.random.normal(ks[0], (NUM_BONDS, IN_FEATURES), jnp.float32),
        'bond_from_bond': jax.random.normal(ks[1], (NUM_BONDS, IN_FEATURES), jnp.float32),
        'atom_from_atom': jax.random.normal(ks[2], (NUM_ATOMS, IN_FEATURES), jnp.float32),
        'atom_from_bond': jax.random.normal(ks[3], (NUM_ATOMS, IN_FEATURES), jnp.float32),
    }

    scale = 1.0 / np.sqrt(IN_FEATURES)
    # Linear weights stored transposed (in_features, fg_size) so the kernel
    # computes pooled @ W^T + b exactly as nn.Linear does.
    params = {
        'w_atom_from_atom_t': jax.random.normal(ks[4], (IN_FEATURES, FG_SIZE), jnp.float32) * scale,
        'w_atom_from_bond_t': jax.random.normal(ks[5], (IN_FEATURES, FG_SIZE), jnp.float32) * scale,
        'w_bond_from_atom_t': jax.random.normal(ks[6], (IN_FEATURES, FG_SIZE), jnp.float32) * scale,
        'w_bond_from_bond_t': jax.random.normal(ks[7], (IN_FEATURES, FG_SIZE), jnp.float32) * scale,
        'b_atom_from_atom': jax.random.normal(ks[8], (FG_SIZE,), jnp.float32) * 0.01,
        'b_atom_from_bond': jax.random.normal(ks[9], (FG_SIZE,), jnp.float32) * 0.01,
        'b_bond_from_atom': jax.random.normal(ks[10], (FG_SIZE,), jnp.float32) * 0.01,
        'b_bond_from_bond': jax.random.normal(ks[11], (FG_SIZE,), jnp.float32) * 0.01,
    }

    preds = grover_functional_group_predictor(embeddings, atom_scope, bond_scope, params)
    jax.block_until_ready(preds)

    ref = _predictor_ref(embeddings, atom_scope, bond_scope, params)
    for name in ('atom_from_atom', 'atom_from_bond',
                 'bond_from_atom', 'bond_from_bond'):
        assert preds[name].shape == (num_mols, FG_SIZE), name
        # bf16 embedding cast in the pooling matmul -> relaxed tolerance.
        assert jnp.allclose(preds[name], ref[name], atol=1e-2, rtol=1e-2), name

    print("KERNEL_OK")
</pallas_src>

<mosaic_0001>
module attributes {stable_mosaic.version = 11 : i64} {
  func.func @_fused_readout_linear_kernel(%arg0: i32, %arg1: i32, %arg2: memref<1xi32, #tpu.memory_space<smem>>, %arg3: memref<1xi32, #tpu.memory_space<smem>>, %arg4: memref<8x1xi32, #tpu.memory_space<vmem>>, %arg5: memref<8x1xi32, #tpu.memory_space<vmem>>, %arg6: memref<8x1xf32, #tpu.memory_space<vmem>>, %arg7: memref<128x128xbf16, #tpu.memory_space<vmem>>, %arg8: memref<128x128xbf16, #tpu.memory_space<vmem>>, %arg9: memref<128x128xf32, #tpu.memory_space<vmem>>, %arg10: memref<128x128xf32, #tpu.memory_space<vmem>>, %arg11: memref<1x128xf32, #tpu.memory_space<vmem>>, %arg12: memref<1x128xf32, #tpu.memory_space<vmem>>, %arg13: memref<8x128xf32, #tpu.memory_space<vmem>>, %arg14: memref<8x128xf32, #tpu.memory_space<vmem>>, %arg15: memref<8x128xf32, #tpu.memory_space<vmem>>, %arg16: memref<8x128xf32, #tpu.memory_space<vmem>>) attributes {dimension_semantics = [#tpu.dimension_semantics<parallel>, #tpu.dimension_semantics<arbitrary>], iteration_bounds = array<i64: 1, 1>, scalar_prefetch = 2 : i64, scratch_operands = 2 : i64, tpu.core_type = #tpu.core_type<tc>, window_params = [{transform_indices = @transform_0, window_bounds = array<i64: 8, 1>}, {transform_indices = @transform_1, window_bounds = array<i64: 8, 1>}, {transform_indices = @transform_2, window_bounds = array<i64: 8, 1>}, {transform_indices = @transform_3, window_bounds = array<i64: 128, 128>}, {transform_indices = @transform_4, window_bounds = array<i64: 128, 128>}, {pipeline_mode = #tpu.pipeline_mode<synchronous>, transform_indices = @transform_5, window_bounds = array<i64: 128, 128>}, {pipeline_mode = #tpu.pipeline_mode<synchronous>, transform_indices = @transform_6, window_bounds = array<i64: 128, 128>}, {pipeline_mode = #tpu.pipeline_mode<synchronous>, transform_indices = @transform_7, window_bounds = array<i64: 1, 128>}, {pipeline_mode = #tpu.pipeline_mode<synchronous>, transform_indices = @transform_8, window_bounds = array<i64: 1, 128>}, {transform_indices = @transform_9, window_bounds = array<i64: 8, 128>}, {transform_indices = @transform_10, window_bounds = array<i64: 8, 128>}]} {
    %c0_i32 = arith.constant 0 : i32
    %0 = arith.cmpi eq, %arg1, %c0_i32 : i32
    %1 = arith.extui %0 : i1 to i32
    %c0_i32_0 = arith.constant 0 : i32
    %2 = arith.cmpi ne, %1, %c0_i32_0 : i32
    scf.if %2 {
      %cst = arith.constant 0.000000e+00 : f32
      %17 = vector.broadcast %cst : f32 to vector<8x128xf32>
      %c0 = arith.constant 0 : index
      %c0_5 = arith.constant 0 : index
      %18 = vector.load %arg15[%c0, %c0_5] : memref<8x128xf32, #tpu.memory_space<vmem>>, vector<8x128xf32>
      tpu.vector_store %arg15[%c0, %c0_5], %17 {strides = array<i32>} : memref<8x128xf32, #tpu.memory_space<vmem>>, vector<8x128xf32>,
      %cst_6 = arith.constant 0.000000e+00 : f32
      %19 = vector.broadcast %cst_6 : f32 to vector<8x128xf32>
      %c0_7 = arith.constant 0 : index
      %c0_8 = arith.constant 0 : index
      %20 = vector.load %arg16[%c0_7, %c0_8] : memref<8x128xf32, #tpu.memory_space<vmem>>, vector<8x128xf32>
      tpu.vector_store %arg16[%c0_7, %c0_8], %19 {strides = array<i32>} : memref<8x128xf32, #tpu.memory_space<vmem>>, vector<8x128xf32>,
    } else {
    }
    %c128_i32 = arith.constant 128 : i32
    %3 = arith.muli %arg1, %c128_i32 : i32
    %4 = arith.index_cast %arg0 : i32 to index
    %5 = memref.load %arg3[%4] : memref<1xi32, #tpu.memory_space<smem>>
    %6 = arith.cmpi slt, %3, %5 : i32
    %c128_i32_1 = arith.constant 128 : i32
    %7 = arith.addi %3, %c128_i32_1 : i32
    %8 = arith.index_cast %arg0 : i32 to index
    %9 = memref.load %arg2[%8] : memref<1xi32, #tpu.memory_space<smem>>
    %10 = arith.cmpi sgt, %7, %9 : i32
    %11 = arith.andi %6, %10 : i1
    %12 = arith.extui %11 : i1 to i32
    %c0_i32_2 = arith.constant 0 : i32
    %13 = arith.cmpi ne, %12, %c0_i32_2 : i32
    scf.if %13 {
      %17 = tpu.iota {dimensions = array<i32: 1>} : vector<8x128xi32>
      %18 = vector.broadcast %3 : i32 to vector<8x128xi32>
      %19 = arith.addi %17, %18 : vector<8x128xi32>
      %c0 = arith.constant 0 : index
      %c0_5 = arith.constant 0 : index
      %20 = vector.load %arg4[%c0, %c0_5] : memref<8x1xi32, #tpu.memory_space<vmem>>, vector<8x1xi32>
      %21 = vector.broadcast %20 : vector<8x1xi32> to vector<8x128xi32>
      %22 = arith.cmpi sge, %19, %21 : vector<8x128xi32>
      %c0_6 = arith.constant 0 : index
      %c0_7 = arith.constant 0 : index
      %23 = vector.load %arg5[%c0_6, %c0_7] : memref<8x1xi32, #tpu.memory_space<vmem>>, vector<8x1xi32>
      %24 = vector.broadcast %23 : vector<8x1xi32> to vector<8x128xi32>
      %25 = arith.cmpi slt, %19, %24 : vector<8x128xi32>
      %26 = arith.andi %22, %25 : vector<8x128xi1>
      %27 = arith.extui %26 : vector<8x128xi1> to vector<8x128xi32>
      %28 = arith.sitofp %27 : vector<8x128xi32> to vector<8x128xf32>
      %29 = arith.truncf %28 : vector<8x128xf32> to vector<8x128xbf16>
      %c0_8 = arith.constant 0 : index
      %c0_9 = arith.constant 0 : index
      %30 = vector.load %arg15[%c0_8, %c0_9] : memref<8x128xf32, #tpu.memory_space<vmem>>, vector<8x128xf32>
      %c0_10 = arith.constant 0 : index
      %c0_11 = arith.constant 0 : index
      %31 = vector.load %arg7[%c0_10, %c0_11] : memref<128x128xbf16, #tpu.memory_space<vmem>>, vector<128x128xbf16>
      %cst = arith.constant dense<0.000000e+00> : vector<8x128xf32>
      %32 = tpu.matmul %29, %31, %cst {dimension_numbers = #tpu.dot_dimension_numbers<[1], [0], [0], [1], [0, 0, 1, 1], [], []>} : vector<8x128xbf16>, vector<128x128xbf16>, vector<8x128xf32> -> vector<8x128xf32>
      %33 = arith.addf %30, %32 : vector<8x128xf32>
      %c0_12 = arith.constant 0 : index
      %c0_13 = arith.constant 0 : index
      %34 = vector.load %arg15[%c0_12, %c0_13] : memref<8x128xf32, #tpu.memory_space<vmem>>, vector<8x128xf32>
      tpu.vector_store %arg15[%c0_12, %c0_13], %33 {strides = array<i32>} : memref<8x128xf32, #tpu.memory_space<vmem>>, vector<8x128xf32>,
      %c0_14 = arith.constant 0 : index
      %c0_15 = arith.constant 0 : index
      %35 = vector.load %arg16[%c0_14, %c0_15] : memref<8x128xf32, #tpu.memory_space<vmem>>, vector<8x128xf32>
      %c0_16 = arith.constant 0 : index
      %c0_17 = arith.constant 0 : index
      %36 = vector.load %arg8[%c0_16, %c0_17] : memref<128x128xbf16, #tpu.memory_space<vmem>>, vector<128x128xbf16>
      %cst_18 = arith.constant dense<0.000000e+00> : vector<8x128xf32>
      %37 = tpu.matmul %29, %36, %cst_18 {dimension_numbers = #tpu.dot_dimension_numbers<[1], [0], [0], [1], [0, 0, 1, 1], [], []>} : vector<8x128xbf16>, vector<128x128xbf16>, vector<8x128xf32> -> vector<8x128xf32>
      %38 = arith.addf %35, %37 : vector<8x128xf32>
      %c0_19 = arith.constant 0 : index
      %c0_20 = arith.constant 0 : index
      %39 = vector.load %arg16[%c0_19, %c0_20] : memref<8x128xf32, #tpu.memory_space<vmem>>, vector<8x128xf32>
      tpu.vector_store %arg16[%c0_19, %c0_20], %38 {strides = array<i32>} : memref<8x128xf32, #tpu.memory_space<vmem>>, vector<8x128xf32>,
    } else {
    }
    %c0_i32_3 = arith.constant 0 : i32
    %14 = arith.cmpi eq, %arg1, %c0_i32_3 : i32
    %15 = arith.extui %14 : i1 to i32
    %c0_i32_4 = arith.constant 0 : i32
    %16 = arith.cmpi ne, %15, %c0_i32_4 : i32
    scf.if %16 {
      %c0 = arith.constant 0 : index
      %c0_5 = arith.constant 0 : index
      %17 = vector.load %arg15[%c0, %c0_5] : memref<8x128xf32, #tpu.memory_space<vmem>>, vector<8x128xf32>
      %c0_6 = arith.constant 0 : index
      %c0_7 = arith.constant 0 : index
      %18 = vector.load %arg6[%c0_6, %c0_7] : memref<8x1xf32, #tpu.memory_space<vmem>>, vector<8x1xf32>
      %19 = vector.broadcast %18 : vector<8x1xf32> to vector<8x128xf32>
      %20 = arith.mulf %17, %19 : vector<8x128xf32>
      %c0_8 = arith.constant 0 : index
      %c0_9 = arith.constant 0 : index
      %21 = vector.load %arg16[%c0_8, %c0_9] : memref<8x128xf32, #tpu.memory_space<vmem>>, vector<8x128xf32>
      %c0_10 = arith.constant 0 : index
      %c0_11 = arith.constant 0 : index
      %22 = vector.load %arg6[%c0_10, %c0_11] : memref<8x1xf32, #tpu.memory_space<vmem>>, vector<8x1xf32>
      %23 = vector.broadcast %22 : vector<8x1xf32> to vector<8x128xf32>
      %24 = arith.mulf %21, %23 : vector<8x128xf32>
      %c0_12 = arith.constant 0 : index
      %c0_13 = arith.constant 0 : index
      %25 = vector.load %arg9[%c0_12, %c0_13] : memref<128x128xf32, #tpu.memory_space<vmem>>, vector<128x128xf32>
      %cst = arith.constant dense<0.000000e+00> : vector<8x128xf32>
      %26 = tpu.matmul %20, %25, %cst {dimension_numbers = #tpu.dot_dimension_numbers<[1], [0], [0], [1], [0, 0, 1, 1], [], []>} : vector<8x128xf32>, vector<128x128xf32>, vector<8x128xf32> -> vector<8x128xf32>
      %c0_14 = arith.constant 0 : index
      %c0_15 = arith.constant 0 : index
      %27 = vector.load %arg11[%c0_14, %c0_15] : memref<1x128xf32, #tpu.memory_space<vmem>>, vector<1x128xf32>
      %28 = vector.broadcast %27 : vector<1x128xf32> to vector<8x128xf32>
      %29 = arith.addf %26, %28 : vector<8x128xf32>
      %c0_16 = arith.constant 0 : index
      %c0_17 = arith.constant 0 : index
      %30 = vector.load %arg13[%c0_16, %c0_17] : memref<8x128xf32, #tpu.memory_space<vmem>>, vector<8x128xf32>
      tpu.vector_store %arg13[%c0_16, %c0_17], %29 {strides = array<i32>} : memref<8x128xf32, #tpu.memory_space<vmem>>, vector<8x128xf32>,
      %c0_18 = arith.constant 0 : index
      %c0_19 = arith.constant 0 : index
      %31 = vector.load %arg10[%c0_18, %c0_19] : memref<128x128xf32, #tpu.memory_space<vmem>>, vector<128x128xf32>
      %cst_20 = arith.constant dense<0.000000e+00> : vector<8x128xf32>
      %32 = tpu.matmul %24, %31, %cst_20 {dimension_numbers = #tpu.dot_dimension_numbers<[1], [0], [0], [1], [0, 0, 1, 1], [], []>} : vector<8x128xf32>, vector<128x128xf32>, vector<8x128xf32> -> vector<8x128xf32>
      %c0_21 = arith.constant 0 : index
      %c0_22 = arith.constant 0 : index
      %33 = vector.load %arg12[%c0_21, %c0_22] : memref<1x128xf32, #tpu.memory_space<vmem>>, vector<1x128xf32>
      %34 = vector.broadcast %33 : vector<1x128xf32> to vector<8x128xf32>
      %35 = arith.addf %32, %34 : vector<8x128xf32>
      %c0_23 = arith.constant 0 : index
      %c0_24 = arith.constant 0 : index
      %36 = vector.load %arg14[%c0_23, %c0_24] : memref<8x128xf32, #tpu.memory_space<vmem>>, vector<8x128xf32>
      tpu.vector_store %arg14[%c0_23, %c0_24], %35 {strides = array<i32>} : memref<8x128xf32, #tpu.memory_space<vmem>>, vector<8x128xf32>,
    } else {
    }
    return
  }
  func.func @transform_0(%arg0: i32, %arg1: i32, %arg2: memref<1xi32, #tpu.memory_space<smem>>, %arg3: memref<1xi32, #tpu.memory_space<smem>>) -> (i32, i32) {
    %c0_i32 = arith.constant 0 : i32
    %c0_i32_0 = arith.constant 0 : i32
    return %arg0, %c0_i32 : i32, i32
  }
  func.func @transform_1(%arg0: i32, %arg1: i32, %arg2: memref<1xi32, #tpu.memory_space<smem>>, %arg3: memref<1xi32, #tpu.memory_space<smem>>) -> (i32, i32) {
    %c0_i32 = arith.constant 0 : i32
    %c0_i32_0 = arith.constant 0 : i32
    return %arg0, %c0_i32 : i32, i32
  }
  func.func @transform_2(%arg0: i32, %arg1: i32, %arg2: memref<1xi32, #tpu.memory_space<smem>>, %arg3: memref<1xi32, #tpu.memory_space<smem>>) -> (i32, i32) {
    %c0_i32 = arith.constant 0 : i32
    %c0_i32_0 = arith.constant 0 : i32
    return %arg0, %c0_i32 : i32, i32
  }
  func.func @transform_3(%arg0: i32, %arg1: i32, %arg2: memref<1xi32, #tpu.memory_space<smem>>, %arg3: memref<1xi32, #tpu.memory_space<smem>>) -> (i32, i32) {
    %c0_i32 = arith.constant 0 : i32
    %c0_i32_0 = arith.constant 0 : i32
    return %arg1, %c0_i32 : i32, i32
  }
  func.func @transform_4(%arg0: i32, %arg1: i32, %arg2: memref<1xi32, #tpu.memory_space<smem>>, %arg3: memref<1xi32, #tpu.memory_space<smem>>) -> (i32, i32) {
    %c0_i32 = arith.constant 0 : i32
    %c0_i32_0 = arith.constant 0 : i32
    return %arg1, %c0_i32 : i32, i32
  }
  func.func @transform_5(%arg0: i32, %arg1: i32, %arg2: memref<1xi32, #tpu.memory_space<smem>>, %arg3: memref<1xi32, #tpu.memory_space<smem>>) -> (i32, i32) {
    %c0_i32 = arith.constant 0 : i32
    %c0_i32_0 = arith.constant 0 : i32
    %c0_i32_1 = arith.constant 0 : i32
    return %c0_i32, %c0_i32_0 : i32, i32
  }
  func.func @transform_6(%arg0: i32, %arg1: i32, %arg2: memref<1xi32, #tpu.memory_space<smem>>, %arg3: memref<1xi32, #tpu.memory_space<smem>>) -> (i32, i32) {
    %c0_i32 = arith.constant 0 : i32
    %c0_i32_0 = arith.constant 0 : i32
    %c0_i32_1 = arith.constant 0 : i32
    return %c0_i32, %c0_i32_0 : i32, i32
  }
  func.func @transform_7(%arg0: i32, %arg1: i32, %arg2: memref<1xi32, #tpu.memory_space<smem>>, %arg3: memref<1xi32, #tpu.memory_space<smem>>) -> (i32, i32) {
    %c0_i32 = arith.constant 0 : i32
    %c0_i32_0 = arith.constant 0 : i32
    %c0_i32_1 = arith.constant 0 : i32
    return %c0_i32, %c0_i32_0 : i32, i32
  }
  func.func @transform_8(%arg0: i32, %arg1: i32, %arg2: memref<1xi32, #tpu.memory_space<smem>>, %arg3: memref<1xi32, #tpu.memory_space<smem>>) -> (i32, i32) {
    %c0_i32 = arith.constant 0 : i32
    %c0_i32_0 = arith.constant 0 : i32
    %c0_i32_1 = arith.constant 0 : i32
    return %c0_i32, %c0_i32_0 : i32, i32
  }
  func.func @transform_9(%arg0: i32, %arg1: i32, %arg2: memref<1xi32, #tpu.memory_space<smem>>, %arg3: memref<1xi32, #tpu.memory_space<smem>>) -> (i32, i32) {
    %c0_i32 = arith.constant 0 : i32
    %c0_i32_0 = arith.constant 0 : i32
    return %arg0, %c0_i32 : i32, i32
  }
  func.func @transform_10(%arg0: i32, %arg1: i32, %arg2: memref<1xi32, #tpu.memory_space<smem>>, %arg3: memref<1xi32, #tpu.memory_space<smem>>) -> (i32, i32) {
    %c0_i32 = arith.constant 0 : i32
    %c0_i32_0 = arith.constant 0 : i32
    return %arg0, %c0_i32 : i32, i32
  }
}

</mosaic_0001>

<bundles_post_ra>
// kernel: tpu_custom_call.1
= control target key start
LH: loop header
LB: loop body
LE: loop exit
PB: predicated region body
PF: predicated region fallthrough
CT: control target
= control target key end

     0   :  { %20 = vsyncpa [#allocation8], 0  ;;  %s804_s0 = inlined_call_operand.<no memory space> [shape: s32[1], index: 0, kind: input, shape index: {}]   ;;  %s805_s1 = inlined_call_operand.<no memory space> [shape: s32[1], index: 1, kind: input, shape index: {}]   ;;  %s806_s2 = inlined_call_operand.vmem [shape: s32[8,1], index: 2, kind: input, shape index: {}]   ;;  %s807_s3 = inlined_call_operand.vmem [shape: s32[8,1], index: 3, kind: input, shape index: {}]   ;;  %s808_s4 = inlined_call_operand.vmem [shape: f32[8,1], index: 4, kind: input, shape index: {}]   ;;  %s809_s5 = inlined_call_operand.hbm [shape: bf16[128,128], index: 5, kind: input, shape index: {}]   ;;  %s810_s6 = inlined_call_operand.hbm [shape: bf16[128,128], index: 6, kind: input, shape index: {}]   ;;  %s811_s7 = inlined_call_operand.hbm [shape: f32[128,128], index: 7, kind: input, shape index: {}]   ;;  %s812_s8 = inlined_call_operand.hbm [shape: f32[128,128], index: 8, kind: input, shape index: {}]   ;;  %s813_s9 = inlined_call_operand.vmem [shape: f32[1,128], index: 9, kind: input, shape index: {}]   ;;  %s814_s10 = inlined_call_operand.vmem [shape: f32[1,128], index: 10, kind: input, shape index: {}]   ;;  %s815_s11 = inlined_call_operand.hbm [shape: f32[8,128], index: 11, kind: output, shape index: {0}]   ;;  %s816_s12 = inlined_call_operand.hbm [shape: f32[8,128], index: 12, kind: output, shape index: {1}]  }
   0x1   :  { %21 = vsyncpa [#allocation11], 0 }
   0x2   :  { %22 = vsyncpa [#allocation14], 0 }
   0x3   :  { %23 = vsyncpa [#allocation9], 0 }
   0x4   :  { %24 = vsyncpa [#allocation17], 0  ;;  %s48_s23 = sshll.u32 %s810_s6, 4  ;;  %s686_s24 = smov [#allocation10]   ;;  %s49_s23 = int_to_ptr.hbm [resolvable:$true] %s48_s23 }
   0x5   :  { %s50_s25 = sshll.u32 %s686_s24, 4  ;;  %s35_s28 = sshll.u32 %s809_s5, 4  ;;  %s51_s25 = int_to_ptr.vmem [resolvable:$true] %s50_s25  ;;  %s36_s28 = int_to_ptr.hbm [resolvable:$true] %s35_s28 }
   0x6   :  { %s687_s29 = smov 64   ;;  %s688_s30 = smov 4  }
   0x7   :  { %56 = dma.hbm_to_vmem [thread:$0]  %s49_s23, 1024, %s51_s25, [#allocation11], %s687_s29, %s687_s29, %s688_s30  }
   0x8   :  { %s689_s13 = smov [#allocation7]   ;;  %s61_s17 = sshll.u32 %s811_s7, 4  ;;  %s62_s17 = int_to_ptr.hbm [resolvable:$true] %s61_s17 }
   0x9   :  { %s37_s14 = sshll.u32 %s689_s13, 4  ;;  %s690_s6 = smov [#allocation12]   ;;  %s38_s14 = int_to_ptr.vmem [resolvable:$true] %s37_s14 }
   0xa   :  { %43 = dma.hbm_to_vmem [thread:$0]  %s36_s28, 1024, %s38_s14, [#allocation8], %s687_s29, %s687_s29, %s688_s30  }
   0xb   :  { %s63_s18 = sshll.u32 %s690_s6, 4  ;;  %s74_s5 = sshll.u32 %s812_s8, 4  ;;  %s64_s18 = int_to_ptr.vmem [resolvable:$true] %s63_s18  ;;  %s75_s5 = int_to_ptr.hbm [resolvable:$true] %s74_s5 }
   0xc   :  { %s691_s21 = smov 128   ;;  %s692_s22 = smov 8  }
   0xd   :  { %69 = dma.hbm_to_vmem [thread:$0]  %s62_s17, 2048, %s64_s18, [#allocation11], %s691_s21, %s691_s21, %s692_s22  }
   0xe   :  { %s693_s23 = smov [#allocation13]  }
   0xf   :  { %s76_s24 = sshll.u32 %s693_s23, 4  ;;  %s77_s24 = int_to_ptr.vmem [resolvable:$true] %s76_s24 }
  0x10   :  { %82 = dma.hbm_to_vmem [thread:$0]  %s75_s5, 2048, %s77_s24, [#allocation14], %s691_s21, %s691_s21, %s692_s22  }
  0x11   :  { %676 = dma.done.wait [#allocation8], 1024  }
  0x12   :  { %677 = vsyncadd [#allocation8], 4294966272 }
  0x13   :  { %678 = dma.done.wait [#allocation11], 3072  }
  0x14   :  { %679 = vsyncadd [#allocation11], 4294964224 }
  0x15   :  { %680 = dma.done.wait [#allocation14], 2048  }
  0x16   :  { %681 = vsyncadd [#allocation14], 4294965248  ;;  %p427_p0 = scmp.gt.s32.totalorder %s805_s1, 0  ;;  %p428_p1 = scmp.lt.s32.totalorder %s804_s0, 128  ;;  %v694_v0 = vmov 0.0  }
  0x17   :  { %107 = vst [vmem:[#allocation2] sm:$0xff] %v694_v0 }
  0x18   :  { %108 = vst [vmem:[#allocation3] sm:$0xff] %v694_v0  ;;  %p115_p2 = pnand %p428_p1, %p427_p0 }
  0x1a   :  { %118 = sbr.rel (%p115_p2) target bundleno = 293 (0x125), region = 61 }
  0x1f   :  { %v123_v1 = vld [vmem:[%s806_s2] sm:$0xff]  ;;  %v505_v2 = vld [vmem:[#allocation7 + $0x38] sm:$0xff]  ;;  %v695_v3 = vmov 0   ;;  %v503_v7 = vld [vmem:[#allocation7 + $0x28] sm:$0xff]  ;;  %v119_v21 = vlaneseq  ;;  %v696_v24 = vmov 1.0|1.0  }
  0x20   :  { %528 = vset.pattern.permute.xlu0 %v695_v3  ;;  %v513_v4 = vld [vmem:[#allocation10 + $0x38] sm:$0xff]  ;;  %202 = vmatpush.bf16.msra.mxu0 %v505_v2  ;;  %v504_v5 = vld [vmem:[#allocation7 + $0x30] sm:$0xff]  ;;  %v511_v9 = vld [vmem:[#allocation10 + $0x28] sm:$0xff] }
  0x21   :  { %125 = vperm.xlu0 %528, %v123_v1   ;;  %282 = vmatpush.bf16.msra.mxu1 %v513_v4  ;;  %v512_v6 = vld [vmem:[#allocation10 + $0x30] sm:$0xff]  ;;  %v502_v10 = vld [vmem:[#allocation7 + $0x20] sm:$0xff]  ;;  %v501_v12 = vld [vmem:[#allocation7 + $0x18] sm:$0xff]  ;;  %v120_v22 = vand.u32 127, %v119_v21 }
  0x22   :  { %v128_v8 = vld [vmem:[%s807_s3] sm:$0xff]  ;;  %v510_v11 = vld [vmem:[#allocation10 + $0x20] sm:$0xff]  ;;  %v509_v13 = vld [vmem:[#allocation10 + $0x18] sm:$0xff] }
  0x23   :  { %v500_v14 = vld [vmem:[#allocation7 + $0x10] sm:$0xff]  ;;  %v499_v16 = vld [vmem:[#allocation7 + $0x8] sm:$0xff]  ;;  %v498_v18 = vld [vmem:[#allocation7] sm:$0xff] }
  0x24   :  { %203 = vmatpush.bf16.msra.mxu0 %v504_v5  ;;  %v508_v15 = vld [vmem:[#allocation10 + $0x10] sm:$0xff]  ;;  %v507_v17 = vld [vmem:[#allocation10 + $0x8] sm:$0xff]  ;;  %v506_v19 = vld [vmem:[#allocation10] sm:$0xff] }
  0x25   :  { %283 = vmatpush.bf16.msra.mxu1 %v512_v6  ;;  %v137_v25 = vld [vmem:[#allocation2] sm:$0xff]  ;;  %v217_v26 = vld [vmem:[#allocation3] sm:$0xff] }
  0x28   :  { %204 = vmatpush.bf16.msra.mxu0 %v503_v7 }
  0x29   :  { %130 = vperm.xlu0 %528, %v128_v8   ;;  %284 = vmatpush.bf16.msra.mxu1 %v511_v9 }
  0x2c   :  { %205 = vmatpush.bf16.msra.mxu0 %v502_v10 }
  0x2d   :  { %285 = vmatpush.bf16.msra.mxu1 %v510_v11 }
  0x30   :  { %206 = vmatpush.bf16.msra.mxu0 %v501_v12 }
  0x31   :  { %286 = vmatpush.bf16.msra.mxu1 %v509_v13 }
  0x34   :  { %207 = vmatpush.bf16.msra.mxu0 %v500_v14 }
  0x35   :  { %287 = vmatpush.bf16.msra.mxu1 %v508_v15 }
  0x38   :  { %208 = vmatpush.bf16.msra.mxu0 %v499_v16 }
  0x39   :  { %288 = vmatpush.bf16.msra.mxu1 %v507_v17 }
  0x3c   :  { %209 = vmatpush.bf16.msra.mxu0 %v498_v18 }
  0x3d   :  { %289 = vmatpush.bf16.msra.mxu1 %v506_v19 }
  0x93   :  { %v126_v20 = vpop.permute.xlu0 %125 }
  0x94   :  { %vm127_vm0 = vcmp.ge.s32.totalorder %v120_v22, %v126_v20 }
  0x9b   :  { %v131_v23 = vpop.permute.xlu0 %130 }
  0x9c   :  { %vm132_vm1 = vcmp.lt.s32.totalorder %v120_v22, %v131_v23 }
  0x9d   :  { %vm133_vm2 = vmand %vm127_vm0, %vm132_vm1 }
  0x9e   :  { %vm462_vm3 = vmpackc.low %vm133_vm2, %vm133_vm2 }
  0x9f   :  { %463 = vmatmul.msk.bf16.vlgmr.msra.gmra.mxu0 %vm462_vm3, %v696_v24  ;;  %497 = vmatmul.msk.bf16.vlgmr.msra.gmra.mxu1 %vm462_vm3, %v696_v24 }
 0x11c   :  { %v211_v27 = vpop.f32.mrf.mxu0  ;;  %v291_v28 = vpop.f32.mrf.mxu1 }
 0x11d   :  { %v215_v29 = vadd.f32 %v211_v27, %v137_v25  ;;  %v295_v30 = vadd.f32 %v291_v28, %v217_v26 }
 0x11f   :  { %216 = vst [vmem:[#allocation2] sm:$0xff] %v215_v29 }
 0x120   :  { %296 = vst [vmem:[#allocation3] sm:$0xff] %v295_v30 }
 0x124   :  { %v213_v31 = vpop.f32.mrf.mxu0  ;;  %v293_v32 = vpop.f32.mrf.mxu1 }
 0x125 PF:  { %v301_v33 = vld [vmem:[%s808_s4] sm:$0xff]  ;;  %v325_v34 = vld [vmem:[#allocation12 + $0x78] sm:$0xff]  ;;  %v697_v36 = vmov 0   ;;  %v323_v39 = vld [vmem:[#allocation12 + $0x68] sm:$0xff]  ;;  %s698_s14 = smov [#allocation15]   ;;  %s399_s6 = sshll.u32 %s815_s11, 4  ;;  %s400_s6 = int_to_ptr.hbm [resolvable:$true] %s399_s6 }
 0x126   :  { %v366_v35 = vld [vmem:[#allocation13 + $0x78] sm:$0xff]  ;;  %529 = vset.pattern.permute.xlu0 %v697_v36  ;;  %330 = vmatpush.msra.mxu0 %v325_v34  ;;  %v324_v37 = vld [vmem:[#allocation12 + $0x70] sm:$0xff]  ;;  %v364_v40 = vld [vmem:[#allocation13 + $0x68] sm:$0xff]  ;;  %s397_s15 = sshll.u32 %s698_s14, 4  ;;  %s699_s18 = smov [#allocation16]   ;;  %s398_s15 = int_to_ptr.vmem [resolvable:$true] %s397_s15 }
 0x127   :  { %v365_v38 = vld [vmem:[#allocation13 + $0x70] sm:$0xff]  ;;  %304 = vperm.xlu0 %529, %v301_v33   ;;  %371 = vmatpush.msra.mxu1 %v366_v35  ;;  %v322_v41 = vld [vmem:[#allocation12 + $0x60] sm:$0xff]  ;;  %v321_v43 = vld [vmem:[#allocation12 + $0x58] sm:$0xff]  ;;  %s408_s19 = sshll.u32 %s699_s18, 4  ;;  %s410_s21 = sshll.u32 %s816_s12, 4  ;;  %s409_s19 = int_to_ptr.vmem [resolvable:$true] %s408_s19  ;;  %s411_s21 = int_to_ptr.hbm [resolvable:$true] %s410_s21 }
 0x128   :  { %331 = vmatpush.msra.mxu0 %v324_v37  ;;  %v363_v42 = vld [vmem:[#allocation13 + $0x60] sm:$0xff]  ;;  %v362_v44 = vld [vmem:[#allocation13 + $0x58] sm:$0xff]  ;;  %v320_v45 = vld [vmem:[#allocation12 + $0x50] sm:$0xff] }
 0x129   :  { %372 = vmatpush.msra.mxu1 %v365_v38  ;;  %v361_v46 = vld [vmem:[#allocation13 + $0x50] sm:$0xff]  ;;  %v319_v47 = vld [vmem:[#allocation12 + $0x48] sm:$0xff]  ;;  %v318_v49 = vld [vmem:[#allocation12 + $0x40] sm:$0xff] }
 0x12a   :  { %332 = vmatpush.msra.mxu0 %v323_v39  ;;  %v360_v48 = vld [vmem:[#allocation13 + $0x48] sm:$0xff]  ;;  %v359_v50 = vld [vmem:[#allocation13 + $0x40] sm:$0xff]  ;;  %v317_v51 = vld [vmem:[#allocation12 + $0x38] sm:$0xff] }
 0x12b   :  { %373 = vmatpush.msra.mxu1 %v364_v40  ;;  %v358_v52 = vld [vmem:[#allocation13 + $0x38] sm:$0xff]  ;;  %v316_v53 = vld [vmem:[#allocation12 + $0x30] sm:$0xff]  ;;  %v315_v55 = vld [vmem:[#allocation12 + $0x28] sm:$0xff] }
 0x12c   :  { %333 = vmatpush.msra.mxu0 %v322_v41  ;;  %v357_v54 = vld [vmem:[#allocation13 + $0x30] sm:$0xff]  ;;  %v356_v56 = vld [vmem:[#allocation13 + $0x28] sm:$0xff]  ;;  %v314_v57 = vld [vmem:[#allocation12 + $0x20] sm:$0xff] }
 0x12d   :  { %374 = vmatpush.msra.mxu1 %v363_v42  ;;  %v355_v58 = vld [vmem:[#allocation13 + $0x20] sm:$0xff]  ;;  %v313_v59 = vld [vmem:[#allocation12 + $0x18] sm:$0xff]  ;;  %v312_v61 = vld [vmem:[#allocation12 + $0x10] sm:$0xff] }
 0x12e   :  { %334 = vmatpush.msra.mxu0 %v321_v43  ;;  %v354_v60 = vld [vmem:[#allocation13 + $0x18] sm:$0xff]  ;;  %v353_v62 = vld [vmem:[#allocation13 + $0x10] sm:$0xff]  ;;  %v311_v63 = vld [vmem:[#allocation12 + $0x8] sm:$0xff] }
 0x12f   :  { %375 = vmatpush.msra.mxu1 %v362_v44  ;;  %v352_v0 = vld [vmem:[#allocation13 + $0x8] sm:$0xff]  ;;  %v310_v1 = vld [vmem:[#allocation12] sm:$0xff]  ;;  %v308_v3 = vld [vmem:[#allocation3] sm:$0xff] }
 0x130   :  { %335 = vmatpush.msra.mxu0 %v320_v45  ;;  %v351_v2 = vld [vmem:[#allocation13] sm:$0xff]  ;;  %v300_v4 = vld [vmem:[#allocation2] sm:$0xff] }
 0x131   :  { %376 = vmatpush.msra.mxu1 %v361_v46  ;;  %v530_v8 = vld [vmem:[%s813_s9] ss:$0 sm:$0xff] }
 0x132   :  { %336 = vmatpush.msra.mxu0 %v319_v47  ;;  %v531_v9 = vld [vmem:[%s814_s10] ss:$0 sm:$0xff] }
 0x133   :  { %377 = vmatpush.msra.mxu1 %v360_v48 }
 0x134   :  { %337 = vmatpush.msra.mxu0 %v318_v49 }
 0x135   :  { %378 = vmatpush.msra.mxu1 %v359_v50 }
 0x136   :  { %338 = vmatpush.msra.mxu0 %v317_v51 }
 0x137   :  { %379 = vmatpush.msra.mxu1 %v358_v52 }
 0x138   :  { %339 = vmatpush.msra.mxu0 %v316_v53 }
 0x139   :  { %380 = vmatpush.msra.mxu1 %v357_v54 }
 0x13a   :  { %340 = vmatpush.msra.mxu0 %v315_v55 }
 0x13b   :  { %381 = vmatpush.msra.mxu1 %v356_v56 }
 0x13c   :  { %341 = vmatpush.msra.mxu0 %v314_v57 }
 0x13d   :  { %382 = vmatpush.msra.mxu1 %v355_v58 }
 0x13e   :  { %342 = vmatpush.msra.mxu0 %v313_v59 }
 0x13f   :  { %383 = vmatpush.msra.mxu1 %v354_v60 }
 0x140   :  { %343 = vmatpush.msra.mxu0 %v312_v61 }
 0x141   :  { %384 = vmatpush.msra.mxu1 %v353_v62 }
 0x142   :  { %344 = vmatpush.msra.mxu0 %v311_v63 }
 0x143   :  { %385 = vmatpush.msra.mxu1 %v352_v0 }
 0x144   :  { %345 = vmatpush.msra.mxu0 %v310_v1 }
 0x145   :  { %386 = vmatpush.msra.mxu1 %v351_v2 }
 0x199   :  { %v305_v5 = vpop.permute.xlu0 %304 }
 0x19a   :  { %v307_v6 = vmul.f32 %v305_v5, %v300_v4  ;;  %v309_v7 = vmul.f32 %v308_v3, %v305_v5 }
 0x19c   :  { %346 = vmatmul.f32.vlgmr.msra.gmra.mxu0 %v307_v6  ;;  %387 = vmatmul.f32.vlgmr.msra.gmra.mxu1 %v309_v7 }
 0x219   :  { %v347_v10 = vpop.f32.mrf.mxu0  ;;  %v388_v11 = vpop.f32.mrf.mxu1 }
 0x21a   :  { %v348_v12 = vadd.f32 %v530_v8, %v347_v10  ;;  %v389_v13 = vadd.f32 %v531_v9, %v388_v11 }
 0x21c   :  { %350 = vst [vmem:[#allocation15] sm:$0xff] %v348_v12 }
 0x21d   :  { %391 = vst [vmem:[#allocation16] sm:$0xff] %v389_v13  ;;  %402 = dma.vmem_to_hbm [thread:$0]  %s398_s15, 128, %s400_s6, [#allocation9]  }
 0x21e   :  { %413 = dma.vmem_to_hbm [thread:$0]  %s409_s19, 128, %s411_s21, [#allocation17]  }
 0x21f   :  { %682 = dma.done.wait [#allocation9], 128  }
 0x220   :  { %683 = vsyncadd [#allocation9], 4294967168 }
 0x221   :  { %684 = dma.done.wait [#allocation17], 128  }
 0x222   :  { %685 = vsyncadd [#allocation17], 4294967168 }
 0x223   :  { %422 = vsyncpa [#allocation8], 1 }
 0x224   :  { %423 = vsyncpa [#allocation11], 1 }
 0x225   :  { %424 = vsyncpa [#allocation14], 1 }
 0x226   :  { %425 = vsyncpa [#allocation9], 1 }
 0x227   :  { %426 = vsyncpa [#allocation17], 1 }

</bundles_post_ra>
